<compile_context>
chip_gen: v6e
topology: v6e:2x2x1
jax: 0.10.0
libtpu: 0.0.40
codegen_flags: <defaults>
</compile_context>

<pallas_src>
import functools
import numpy as np
import jax
import jax.numpy as jnp
from jax.experimental import pallas as pl
from jax.experimental.pallas import tpu as pltpu


# ----------------------------- fused matmul kernel ---------------------------

_PROLOGUES = {
    "none":  lambda a: a,
    "leaky": lambda a: jnp.where(a >= 0, a, 0.2 * a),   # LeakyReLU(0.2), bf16
    "relu":  lambda a: jnp.maximum(a, 0.0),
}

_EPILOGUES = {
    "none":     lambda y: y,
    "sig_tanh": lambda y: jax.nn.sigmoid(jnp.tanh(y)),  # Tanh, then final sigmoid
}


def _fused_kernel(n_ops, pre_fn, act_fn, *refs):
    """out = act( sum_i pre(A_i) @ W_i + shift ), f32 accumulation, one K pass.

    refs = (a_0..a_{n-1}, w_0..w_{n-1}, shift, out)."""
    a_refs = refs[:n_ops]
    w_refs = refs[n_ops:2 * n_ops]
    t_ref = refs[2 * n_ops]
    o_ref = refs[2 * n_ops + 1]
    y = jnp.dot(pre_fn(a_refs[0][...]), w_refs[0][...],
                preferred_element_type=jnp.float32)
    for i in range(1, n_ops):
        y = y + jnp.dot(pre_fn(a_refs[i][...]), w_refs[i][...],
                        preferred_element_type=jnp.float32)
    y = y + t_ref[...]
    o_ref[...] = act_fn(y).astype(o_ref.dtype)


def _pick_tm(M, K_total):
    """~1 MiB bf16 A block per grid step, >=2 (>=4 for large M) grid steps."""
    if M < 1024 or M % 8 != 0:
        return M
    min_steps = 4 if M >= 4096 else 2
    cap = min(M // min_steps, max(8, (1 << 20) // max(2 * K_total, 1)))
    tm = 8
    while tm * 2 <= cap and M % (tm * 2) == 0:
        tm *= 2
    return tm


def _pick_tn(N):
    if N % 256 == 0:          # MXU-native width on v6e/v7x
        return 256
    if N % 128 == 0:          # v5e-native width
        return 128
    return N                  # small-N layers: full dim (valid block shape)


def fused_matmul(a_list, b_list, shift, prologue="none", epilogue="none",
                 out_dtype=jnp.bfloat16):
    """out[M,N] = act( sum_i pre(A_i) @ B_i + shift ), f32 accumulation.

    a_list[i]: (M, K_i) bf16 im2col patches ; b_list[i]: (K_i, N) bf16 weights
    (BN scale already folded in) ; shift: (N,) f32 per-channel add."""
    n_ops = len(a_list)
    M = a_list[0].shape[0]
    N = b_list[0].shape[1]
    Ks = [a.shape[1] for a in a_list]
    K_total = sum(Ks)
    pre_fn = _PROLOGUES[prologue]
    act_fn = _EPILOGUES[epilogue]

    tm = _pick_tm(M, K_total)
    tn = _pick_tn(N)
    out_bytes = jnp.dtype(out_dtype).itemsize
    shift2 = shift.reshape(1, N).astype(jnp.float32)

    in_specs = ([pl.BlockSpec((tm, K), lambda i, j: (i, 0)) for K in Ks] +
                [pl.BlockSpec((K, tn), lambda i, j: (0, j)) for K in Ks] +
                [pl.BlockSpec((1, tn), lambda i, j: (0, j))])

    # Double-buffered working set + headroom; >= v5e's 16 MiB default scoped
    # VMEM, capped well under v7x's 64 MiB physical.
    need = 2 * (sum(tm * K * 2 + K * tn * 2 for K in Ks)
                + tm * tn * out_bytes + 4 * tn)
    vmem_limit = int(min(max(need + (4 << 20), 32 << 20), 48 << 20))

    cost = pl.CostEstimate(
        flops=2 * M * N * K_total,
        transcendentals=(2 * M * N if epilogue == "sig_tanh" else 0),
        bytes_accessed=(sum(M * K * 2 + K * N * 2 for K in Ks)
                        + 4 * N + M * N * out_bytes))

    kernel = functools.partial(_fused_kernel, n_ops, pre_fn, act_fn)
    return pl.pallas_call(
        kernel,
        out_shape=jax.ShapeDtypeStruct((M, N), out_dtype),
        grid_spec=pltpu.PrefetchScalarGridSpec(
            num_scalar_prefetch=0,
            grid=(M // tm, N // tn),
            in_specs=in_specs,
            out_specs=pl.BlockSpec((tm, tn), lambda i, j: (i, j))),
        compiler_params=pltpu.CompilerParams(
            dimension_semantics=("parallel", "parallel"),
            vmem_limit_bytes=vmem_limit),
        cost_estimate=cost,
    )(*a_list, *b_list, shift2)


# -------------------------- NHWC conv operator wrappers ----------------------

def conv2d_k4s2p1(x, wmat, shift, prologue, out_dtype=jnp.bfloat16):
    """Conv2d(kernel=4, stride=2, padding=1, bias=False), fused with the
    preceding activation (prologue); BN scale is pre-folded into wmat.
    x: (N,H,W,Cin) ; wmat: (16*Cin, Cout) bf16 ordered (kh, kw, ci)."""
    N, H, W, Cin = x.shape
    Cout = wmat.shape[1]
    Ho, Wo = H // 2, W // 2
    xp = jnp.pad(x.astype(jnp.bfloat16), ((0, 0), (1, 1), (1, 1), (0, 0)))
    cols = [xp[:, kh:kh + 2 * Ho:2, kw:kw + 2 * Wo:2, :]
            for kh in range(4) for kw in range(4)]
    patches = jnp.concatenate(cols, axis=-1).reshape(N * Ho * Wo, 16 * Cin)
    out = fused_matmul([patches], [wmat], shift, prologue=prologue,
                       out_dtype=out_dtype)
    return out.reshape(N, Ho, Wo, Cout)


def _im2col_3x3(x):
    N, H, W, C = x.shape
    xp = jnp.pad(x.astype(jnp.bfloat16), ((0, 0), (1, 1), (1, 1), (0, 0)))
    cols = [xp[:, dh:dh + H, dw:dw + W, :] for dh in range(3) for dw in range(3)]
    return jnp.concatenate(cols, axis=-1).reshape(N * H * W, 9 * C)


def convtranspose2d_k4s2p1(xs, wmats, shift, prologue, epilogue="none",
                           out_dtype=jnp.bfloat16):
    """ConvTranspose2d(kernel=4, stride=2, padding=1) as a 3x3 stride-1 conv
    producing 4*Cout phase channels + depth-to-space (sub-pixel decomposition).
    xs: list of (N,H,W,C_i) tensors whose channel-concat is the ConvT input
    (the skip-connection concat is never materialized); wmats: matching list
    of (9*C_i, 4*Cout) bf16 matrices."""
    N, H, W, _ = xs[0].shape
    Cout = wmats[0].shape[1] // 4
    patches = [_im2col_3x3(x) for x in xs]
    out = fused_matmul(patches, wmats, shift, prologue=prologue,
                       epilogue=epilogue, out_dtype=out_dtype)
    # (M, (r,s,co)) -> (N, 2H, 2W, Cout) depth-to-space
    out = out.reshape(N, H, W, 2, 2, Cout).transpose(0, 1, 3, 2, 4, 5)
    return out.reshape(N, 2 * H, 2 * W, Cout)


# ------------------------------ parameter init --------------------------------

def _bn_fold(key, c, eps=1e-5):
    """Deterministic eval-mode BatchNorm2d folded to per-channel scale/shift."""
    k1, k2, k3, k4 = jax.random.split(key, 4)
    gamma = 1.0 + 0.1 * jax.random.normal(k1, (c,), jnp.float32)
    beta = 0.1 * jax.random.normal(k2, (c,), jnp.float32)
    mean = 0.1 * jax.random.normal(k3, (c,), jnp.float32)
    var = 1.0 + 0.1 * jnp.abs(jax.random.normal(k4, (c,), jnp.float32))
    scale = gamma * jax.lax.rsqrt(var + eps)
    shift = beta - mean * scale
    return scale, shift


def _down_wmat(key, cin, cout, scale=None):
    """Conv2d weight (cout,cin,4,4) -> (16*cin, cout) bf16 matrix, with the
    following BN scale folded into the columns."""
    w = jax.random.normal(key, (cout, cin, 4, 4), jnp.float32) / np.sqrt(cin * 16)
    m = jnp.transpose(w, (2, 3, 1, 0)).reshape(16 * cin, cout)
    if scale is not None:
        m = m * scale[None, :]
    return m.astype(jnp.bfloat16)


# kernel tap used by the 3x3 phase decomposition: _PHASE_K[dh][parity] (-1 = zero)
_PHASE_K = ((3, -1), (1, 2), (-1, 0))


def _phase_wmat(w, scale=None):
    """ConvTranspose2d weight (cin,cout,4,4) -> (9*cin, 4*cout) matrix for the
    equivalent 3x3 stride-1 conv with (r, s, cout)-ordered phase columns."""
    cin, cout = w.shape[0], w.shape[1]
    zero = jnp.zeros((cin, cout), jnp.float32)
    rows = []
    for dh in range(3):
        for dw in range(3):
            cols = []
            for r in range(2):
                for s in range(2):
                    kh, kw = _PHASE_K[dh][r], _PHASE_K[dw][s]
                    cols.append(zero if (kh < 0 or kw < 0)
                                else w[:, :, kh, kw].astype(jnp.float32))
            rows.append(jnp.concatenate(cols, axis=1))
    m = jnp.concatenate(rows, axis=0)
    if scale is not None:
        m = m * jnp.tile(scale, 4)[None, :]     # BN scale per cout, all 4 phases
    return m.astype(jnp.bfloat16)


def _up_wmat(key, cin, cout, scale=None):
    w = jax.random.normal(key, (cin, cout, 4, 4), jnp.float32) / np.sqrt(cin * 16)
    return _phase_wmat(w, scale)


def init_unet_block(key, nf, ni, submodule=None, input_c=None,
                    dropout=False, innermost=False, outermost=False):
    if input_c is None:
        input_c = nf
    ks = jax.random.split(key, 8)
    p = dict(outermost=outermost, innermost=innermost, submodule=submodule)
    if outermost:
        p["down_w"] = _down_wmat(ks[0], input_c, ni)          # no BN on outer down
        p["down_shift"] = jnp.zeros((ni,), jnp.float32)
        # ConvT(ni*2 -> nf) WITH bias; consumes the (x, h) skip pair directly.
        p["up_w_x"] = _up_wmat(ks[1], ni, nf)
        p["up_w_h"] = _up_wmat(ks[2], ni, nf)
        bias = 0.1 * jax.random.normal(ks[3], (nf,), jnp.float32)
        p["up_shift"] = jnp.tile(bias, 4)
    elif innermost:
        p["down_w"] = _down_wmat(ks[0], input_c, ni)          # no BN on inner down
        p["down_shift"] = jnp.zeros((ni,), jnp.float32)
        s, t = _bn_fold(ks[3], nf)
        p["up_w"] = _up_wmat(ks[1], ni, nf, scale=s)          # upnorm scale folded
        p["up_shift"] = jnp.tile(t, 4)
    else:
        s, t = _bn_fold(ks[4], ni)
        p["down_w"] = _down_wmat(ks[0], input_c, ni, scale=s)  # downnorm folded
        p["down_shift"] = t
        s, t = _bn_fold(ks[5], nf)
        p["up_w_x"] = _up_wmat(ks[1], ni, nf, scale=s)         # upnorm folded
        p["up_w_h"] = _up_wmat(ks[2], ni, nf, scale=s)
        p["up_shift"] = jnp.tile(t, 4)
    return p


def init_unet(key, input_c=1, output_c=2, n_down=8, num_filters=64):
    keys = iter(jax.random.split(key, n_down + 1))
    blk = init_unet_block(next(keys), num_filters * 8, num_filters * 8,
                          innermost=True)
    for _ in range(n_down - 5):
        blk = init_unet_block(next(keys), num_filters * 8, num_filters * 8,
                              submodule=blk, dropout=True)
    out_filters = num_filters * 8
    for _ in range(3):
        blk = init_unet_block(next(keys), out_filters // 2, out_filters,
                              submodule=blk)
        out_filters //= 2
    return init_unet_block(next(keys), output_c, out_filters, input_c=input_c,
                           submodule=blk, outermost=True)


# --------------------------------- forward ------------------------------------

def unet_block_forward(p, x):
    """Non-outermost blocks return the skip pair (x, h) instead of concat([x,h]);
    the consuming up-conv sums two matmuls over the two halves (same math,
    no concat HBM round trip)."""
    if p["outermost"]:
        # [downconv] -> submodule -> [ReLU, upconvT(+bias), Tanh] (+ final sigmoid)
        h = conv2d_k4s2p1(x, p["down_w"], p["down_shift"], prologue="none")
        xs, hs = unet_block_forward(p["submodule"], h)
        return convtranspose2d_k4s2p1([xs, hs], [p["up_w_x"], p["up_w_h"]],
                                      p["up_shift"], prologue="relu",
                                      epilogue="sig_tanh", out_dtype=jnp.float32)
    elif p["innermost"]:
        # [LeakyReLU, downconv] -> [ReLU, upconvT, BN] ; skip kept as a pair
        h = conv2d_k4s2p1(x, p["down_w"], p["down_shift"], prologue="leaky")
        up = convtranspose2d_k4s2p1([h], [p["up_w"]], p["up_shift"],
                                    prologue="relu")
        return (x, up)
    else:
        # [LeakyReLU, downconv, BN] -> submodule -> [ReLU, upconvT, BN(,Dropout)]
        h = conv2d_k4s2p1(x, p["down_w"], p["down_shift"], prologue="leaky")
        xs, hs = unet_block_forward(p["submodule"], h)
        up = convtranspose2d_k4s2p1([xs, hs], [p["up_w_x"], p["up_w_h"]],
                                    p["up_shift"], prologue="relu")
        # TODO(synk): nn.Dropout(0.5) is stochastic in train mode; eval-mode
        # (identity) semantics are used here.
        return (x, up)


def unet_forward(params, x_nchw):
    x = jnp.transpose(x_nchw, (0, 2, 3, 1)).astype(jnp.bfloat16)  # NCHW -> NHWC bf16
    y = unet_block_forward(params, x)                             # f32, sigmoid fused
    return jnp.transpose(y, (0, 3, 1, 2))                         # back to NCHW


# ------------------------- ConvTranspose self-check ----------------------------

def _selftest_convtranspose():
    """Validate the sub-pixel ConvT(k=4,s=2,p=1) decomposition against a
    brute-force reference straight from the definition oh = 2*ih - 1 + kh."""
    k1, k2, k3 = jax.random.split(jax.random.PRNGKey(42), 3)
    Ci, Co, H, W = 2, 3, 4, 4
    x = jax.random.normal(k1, (1, H, W, Ci), jnp.float32)
    w = jax.random.normal(k2, (Ci, Co, 4, 4), jnp.float32) / np.sqrt(Ci * 16)
    bias = jax.random.normal(k3, (Co,), jnp.float32)
    got = convtranspose2d_k4s2p1([x], [_phase_wmat(w)], jnp.tile(bias, 4),
                                 prologue="none", out_dtype=jnp.float32)
    got = np.asarray(jax.block_until_ready(got))
    xn, wn = np.asarray(x), np.asarray(w)
    ref = np.zeros((1, 2 * H, 2 * W, Co), np.float32)
    for ih in range(H):
        for iw in range(W):
            for kh in range(4):
                for kw in range(4):
                    oh, ow = 2 * ih - 1 + kh, 2 * iw - 1 + kw
                    if 0 <= oh < 2 * H and 0 <= ow < 2 * W:
                        ref[0, oh, ow, :] += xn[0, ih, iw, :] @ wn[:, :, kh, kw]
    ref = ref + np.asarray(bias)
    assert np.allclose(got, ref, rtol=0.05, atol=0.08), \
        f"convtranspose self-test failed: max err {np.max(np.abs(got - ref))}"


# ----------------------------------- main --------------------------------------

if __name__ == "__main__":
    _selftest_convtranspose()   # bf16-tolerance check of the up-conv decomposition

    root = jax.random.PRNGKey(0)
    pkey, xkey = jax.random.split(root)
    # n_down=8 (module default) requires spatial size to be a multiple of 2**8=256;
    # keep the model small with num_filters=8 and batch=1.
    params = init_unet(pkey, input_c=1, output_c=2, n_down=8, num_filters=8)
    x = jax.random.normal(xkey, (1, 1, 256, 256), jnp.float32)    # NCHW like PyTorch
    fwd = jax.jit(lambda inp: unet_forward(params, inp))
    y = jax.block_until_ready(fwd(x))
    assert y.shape == (1, 2, 256, 256), y.shape
    assert bool(jnp.isfinite(y).all())
    print("KERNEL_OK")
</pallas_src>

<mosaic_0001>
module attributes {stable_mosaic.version = 11 : i64} {
  func.func @_fused_kernel(%arg0: i32, %arg1: i32, %arg2: memref<16x18xbf16, #tpu.memory_space<vmem>>, %arg3: memref<18x12xbf16, #tpu.memory_space<vmem>>, %arg4: memref<1x12xf32, #tpu.memory_space<vmem>>, %arg5: memref<16x12xf32, #tpu.memory_space<vmem>>) attributes {dimension_semantics = [#tpu.dimension_semantics<parallel>, #tpu.dimension_semantics<parallel>], iteration_bounds = array<i64: 1, 1>, scalar_prefetch = 0 : i64, scratch_operands = 0 : i64, tpu.core_type = #tpu.core_type<tc>, window_params = [{transform_indices = @transform_0, window_bounds = array<i64: 16, 18>}, {transform_indices = @transform_1, window_bounds = array<i64: 18, 12>}, {transform_indices = @transform_2, window_bounds = array<i64: 1, 12>}, {transform_indices = @transform_3, window_bounds = array<i64: 16, 12>}]} {
    %c0 = arith.constant 0 : index
    %c0_0 = arith.constant 0 : index
    %0 = vector.load %arg2[%c0, %c0_0] : memref<16x18xbf16, #tpu.memory_space<vmem>>, vector<16x18xbf16>
    %c0_1 = arith.constant 0 : index
    %c0_2 = arith.constant 0 : index
    %1 = vector.load %arg3[%c0_1, %c0_2] : memref<18x12xbf16, #tpu.memory_space<vmem>>, vector<18x12xbf16>
    %cst = arith.constant dense<0.000000e+00> : vector<16x12xf32>
    %2 = tpu.matmul %0, %1, %cst {dimension_numbers = #tpu.dot_dimension_numbers<[1], [0], [0], [1], [0, 0, 1, 1], [], []>} : vector<16x18xbf16>, vector<18x12xbf16>, vector<16x12xf32> -> vector<16x12xf32>
    %c0_3 = arith.constant 0 : index
    %c0_4 = arith.constant 0 : index
    %3 = vector.load %arg4[%c0_3, %c0_4] : memref<1x12xf32, #tpu.memory_space<vmem>>, vector<1x12xf32>
    %4 = vector.broadcast %3 : vector<1x12xf32> to vector<16x12xf32>
    %5 = arith.addf %2, %4 : vector<16x12xf32>
    %c0_5 = arith.constant 0 : index
    %c0_6 = arith.constant 0 : index
    %6 = vector.load %arg5[%c0_5, %c0_6] : memref<16x12xf32, #tpu.memory_space<vmem>>, vector<16x12xf32>
    tpu.vector_store %arg5[%c0_5, %c0_6], %5 {strides = array<i32>} : memref<16x12xf32, #tpu.memory_space<vmem>>, vector<16x12xf32>,
    return
  }
  func.func @transform_0(%arg0: i32, %arg1: i32) -> (i32, i32) {
    %c0_i32 = arith.constant 0 : i32
    %c0_i32_0 = arith.constant 0 : i32
    return %arg0, %c0_i32 : i32, i32
  }
  func.func @transform_1(%arg0: i32, %arg1: i32) -> (i32, i32) {
    %c0_i32 = arith.constant 0 : i32
    %c0_i32_0 = arith.constant 0 : i32
    return %c0_i32, %arg1 : i32, i32
  }
  func.func @transform_2(%arg0: i32, %arg1: i32) -> (i32, i32) {
    %c0_i32 = arith.constant 0 : i32
    %c0_i32_0 = arith.constant 0 : i32
    return %c0_i32, %arg1 : i32, i32
  }
  func.func @transform_3(%arg0: i32, %arg1: i32) -> (i32, i32) {
    %c0_i32 = arith.constant 0 : i32
    return %arg0, %arg1 : i32, i32
  }
}

</mosaic_0001>

<bundles_post_ra>
// kernel: tpu_custom_call.1
= control target key start
LH: loop header
LB: loop body
LE: loop exit
PB: predicated region body
PF: predicated region fallthrough
CT: control target
= control target key end

     0   :  { %v156_v1 = vmov 0.0   ;;  %vm46_vm0 = vcmask 1040384   ;;  %vm157_vm1 = vmmov 0   ;;  %s196_s0 = inlined_call_operand.vmem [shape: bf16[16,18], index: 0, kind: input, shape index: {}]   ;;  %s197_s1 = inlined_call_operand.vmem [shape: bf16[18,12], index: 1, kind: input, shape index: {}]   ;;  %s198_s2 = inlined_call_operand.vmem [shape: f32[1,12], index: 2, kind: input, shape index: {}]   ;;  %s199_s3 = inlined_call_operand.hbm [shape: f32[16,12], index: 3, kind: output, shape index: {}]  }
   0x1   :  { %v131_v0 = vld [vmem:[%s197_s1 + $0x8] ss:$0 sps:$4 sm:$0x11]   ;;  %118 = vmatprep.subr.bf16.mxu0 %v156_v1  ;;  %v132_v3 = vld [vmem:[%s197_s1] sm:$0xff]   ;;  %122 = vmatprep.mubr.msk.bf16.mxu0 %vm157_vm1, %v156_v1 }
   0x2   :  { %v48_v2 = vsel %vm46_vm0, %v131_v0, 0 }
   0x3   :  { %119 = vmatpush3.bf16.msra.mxu0 %v48_v2 }
   0x4   :  { %8 = vsyncpa [#allocation3], 0  ;;  %120 = vmatprep.subr.bf16.mxu0 %v156_v1  ;;  %v133_v4 = vld [vmem:[%s196_s0] sm:$0xff]   ;;  %vm42_vm2 = vcmask 146432   ;;  %vm91_vm3 = vcmask 97280   ;;  %s158_s20 = smov [#allocation2]  }
   0x5   :  { %v110_v5 = vld [vmem:[%s198_s2] ss:$0 sm:$0xff]  ;;  %s99_s1 = sshll.u32 %s158_s20, 4  ;;  %s100_s1 = int_to_ptr.vmem [resolvable:$true] %s99_s1 }
   0x6   :  { %s134_s0 = scalar_lea.vmem %s100_s1, 256  ;;  %p139_p1 = scmp.lt.s32.totalorder %s100_s1, %s100_s1 }
   0x7   :  { %121 = vmatpush3.bf16.msra.mxu0 %v132_v3  ;;  %p135_p0 = scmp.ne.s32.totalorder %s100_s1, %s134_s0  ;;  %p140_p2 = scmp.lt.s32.totalorder %s134_s0, %s134_s0 }
   0x9   :  { %p141_p3 = por %p140_p2, %p139_p1 }
   0xa   :  { %123 = vmatmul.mubr.msk.bf16.vlgmr.msra.gmra.mxu0 %vm42_vm2, %v133_v4 }
   0xb   :  { %p142_p4 = pnand %p141_p3, %p135_p0 }
  0xca   :  { %v84_v6 = vpop.f32.mrf.mxu0 }
  0xcb   :  { %v85_v7 = vadd.f32 %v110_v5, %v84_v6 }
  0xcc   :  { %v124_v8 = vpop.f32.mrf.mxu0 }
  0xcd   :  { %92 = vst.msk [vmem:[#allocation2] sm:$0xff] %vm91_vm3, %v85_v7 }
  0xce   :  { %v87_v9 = vpop.f32.mrf.mxu0 }
  0xcf   :  { %v88_v10 = vadd.f32 %v110_v5, %v87_v9 }
  0xd0   :  { %v125_v11 = vpop.f32.mrf.mxu0 }
  0xd1   :  { %93 = vst.msk [vmem:[#allocation2 + $0x8] sm:$0xff] %vm91_vm3, %v88_v10 }
  0xd2   :  { %145 = shalt.err (!%p142_p4)
}
  0xd3   :  { %s159_s2 = smov 128   ;;  %s160_s21 = smov 8  }
  0xd4   :  { %105 = dma.vmem_to_hbm [thread:$0]  %s100_s1, 256, %s199_s3, [#allocation3], %s159_s2, %s159_s2, %s160_s21  }
  0xd5   :  { %154 = dma.done.wait [#allocation3], 256  }
  0xd6   :  { %155 = vsyncadd [#allocation3], 4294967040 }
  0xd7   :  { %109 = vsyncpa [#allocation3], 1 }

</bundles_post_ra>
